<compile_context>
chip_gen: v5e
topology: v5e:2x2
jax: 0.10.0
libtpu: 0.0.40
codegen_flags: <defaults>
</compile_context>

<pallas_src>
from functools import partial

import jax
import jax.numpy as jnp
from jax.experimental import pallas as pl
from jax.experimental.pallas import tpu as pltpu

# ----- ConvUnit parameters (cuPars) -----------------------------------------
OUT_CHANNELS = 8
CONV_KERNEL = 3
CONV_STRIDE = 1          # implementation assumes stride 1
CONV_PAD = 1
POOL_KERNEL = 2
POOL_STRIDE = 2          # implementation assumes kernel == stride (no overlap)
BN_EPS = 1e-5


# ----- Fused kernel: conv (MXU) + 2x2 maxpool + batchnorm + relu ------------
def _conv_unit_kernel(pat_ref, par_ref, o_ref, *, TP, V, M, inv_m):
    # pat_ref : (TP, V*M) un-replicated im2col patches, lane-dense.
    #           row t = (kh*KW+kw)*CIN+ci (zero-padded to TP rows),
    #           col   = v*M + ph*(N*PW) + n*PW + pw,  v = dh*PK+dw
    # par_ref : (COUT, TP+3) packed params: [ conv W^T | bias | gamma | beta ]
    # o_ref   : (COUT, M)   pooled/normalized output -> one dense (8,128) tile

    # conv: single small MXU matmul, channels land on sublanes, positions on
    # lanes (fully dense).  precision=HIGHEST keeps it effectively f32-exact.
    w = par_ref[:, 0:TP]                                        # (COUT, TP)
    acc = jnp.dot(w, pat_ref[...],
                  preferred_element_type=jnp.float32,
                  precision=jax.lax.Precision.HIGHEST)          # (COUT, V*M)

    # 2x2 max-pool: elementwise max over lane-aligned 128-wide slices
    pooled = acc[:, 0:M]
    for v in range(1, V):
        pooled = jnp.maximum(pooled, acc[:, v * M:(v + 1) * M])  # (COUT, M)
    pooled = pooled + par_ref[:, TP:TP + 1]                      # conv bias

    # BatchNorm2d, training-mode batch statistics (biased variance), full f32.
    # Channel = sublane; all N*PH*PW positions are exactly the M lanes.
    mean = jnp.sum(pooled, axis=1, keepdims=True) * inv_m        # (COUT, 1)
    cent = pooled - mean
    var = jnp.sum(cent * cent, axis=1, keepdims=True) * inv_m    # (COUT, 1)
    scale = par_ref[:, TP + 1:TP + 2] * jax.lax.rsqrt(var + BN_EPS)  # EUP
    o_ref[...] = jnp.maximum(cent * scale + par_ref[:, TP + 2:TP + 3], 0.0)


# ----- Wrapper ---------------------------------------------------------------
def conv_unit_forward(x_nchw, w_oihw, bias, gamma, beta):
    N, CIN, H, W = x_nchw.shape
    COUT, _, KH, KW = w_oihw.shape
    assert CONV_STRIDE == 1 and POOL_KERNEL == POOL_STRIDE
    OH = (H + 2 * CONV_PAD - KH) // CONV_STRIDE + 1
    OW = (W + 2 * CONV_PAD - KW) // CONV_STRIDE + 1
    PK = POOL_KERNEL
    assert OH % PK == 0 and OW % PK == 0
    PH, PW = OH // PK, OW // PK
    V = PK * PK                      # pool-window positions
    T = KH * KW * CIN                # conv taps
    TP = ((T + 7) // 8) * 8          # taps padded to a sublane multiple
    M = PH * N * PW                  # lane width of the output tile
    # Dense unmasked stores / aligned pool slices require a 128-multiple width.
    assert M % 128 == 0, "PH*N*PW must be a multiple of 128 for this layout"
    f32 = jnp.float32

    # glue (all small, <= ~80 KiB): NCHW -> NHWC, zero-pad spatial
    x = jnp.transpose(x_nchw, (0, 2, 3, 1)).astype(f32)
    xp = jnp.pad(x, ((0, 0), (CONV_PAD, CONV_PAD), (CONV_PAD, CONV_PAD), (0, 0)))

    # un-replicated im2col patches, pool-window-major, lane-dense:
    #   pat[(q*CIN+ci), (dh*PK+dw)*M + ph*(N*PW) + n*PW + pw]
    #     = xp[n, PK*ph+dh+kh, PK*pw+dw+kw, ci],   q = kh*KW+kw
    slabs = jnp.stack([xp[:, kh:kh + OH, kw:kw + OW, :]
                       for kh in range(KH) for kw in range(KW)], axis=0)
    slabs = slabs.reshape(KH * KW, N, PH, PK, PW, PK, CIN)
    pat = slabs.transpose(0, 6, 3, 5, 2, 1, 4).reshape(T, V * M)
    pat = jnp.pad(pat, ((0, TP - T), (0, 0)))                 # zero K-pad

    # packed per-channel params: [ W^T | bias | gamma | beta ] -> one DMA
    wT = jnp.transpose(w_oihw.astype(f32), (0, 2, 3, 1)).reshape(COUT, T)
    wT = jnp.pad(wT, ((0, 0), (0, TP - T)))
    params = jnp.concatenate(
        [wT, bias.astype(f32)[:, None], gamma.astype(f32)[:, None],
         beta.astype(f32)[:, None]], axis=1)                  # (COUT, TP+3)

    inv_m = 1.0 / float(N * PH * PW)                          # == 1/M

    out2d = pl.pallas_call(
        partial(_conv_unit_kernel, TP=TP, V=V, M=M, inv_m=inv_m),
        out_shape=jax.ShapeDtypeStruct((COUT, M), f32),
        grid=(1,),
        in_specs=[
            pl.BlockSpec((TP, V * M), lambda i: (0, 0)),
            pl.BlockSpec((COUT, TP + 3), lambda i: (0, 0)),
        ],
        out_specs=pl.BlockSpec((COUT, M), lambda i: (0, 0)),
        compiler_params=pltpu.CompilerParams(
            dimension_semantics=("arbitrary",)),
    )(pat, params)

    # glue: (co, ph*(N*PW)+n*PW+pw) -> NCHW (N, COUT, PH, PW)   (tiny, 8 KiB)
    return out2d.reshape(COUT, PH, N, PW).transpose(2, 0, 1, 3)


# ----- Pure-JAX reference for verification -----------------------------------
def conv_unit_reference(x, w, b, gamma, beta):
    conv = jax.lax.conv_general_dilated(
        x, w, (CONV_STRIDE, CONV_STRIDE),
        [(CONV_PAD, CONV_PAD), (CONV_PAD, CONV_PAD)],
        dimension_numbers=("NCHW", "OIHW", "NCHW"),
        precision=jax.lax.Precision.HIGHEST) + b[None, :, None, None]
    pooled = jax.lax.reduce_window(
        conv, -jnp.inf, jax.lax.max,
        (1, 1, POOL_KERNEL, POOL_KERNEL), (1, 1, POOL_STRIDE, POOL_STRIDE), "VALID")
    mean = pooled.mean(axis=(0, 2, 3), keepdims=True)
    var = ((pooled - mean) ** 2).mean(axis=(0, 2, 3), keepdims=True)
    xn = (pooled - mean) / jnp.sqrt(var + BN_EPS)
    return jnp.maximum(xn * gamma[None, :, None, None] + beta[None, :, None, None], 0.0)


if __name__ == "__main__":
    key = jax.random.PRNGKey(0)
    kx, kw, kb = jax.random.split(key, 3)

    # input_shape = [height, width, num_channels] = [16, 16, 4], batch = 2
    N, CIN, H, W = 2, 4, 16, 16
    x = jax.random.normal(kx, (N, CIN, H, W), dtype=jnp.float32)

    # Deterministic parameters (mirrors nn.Conv2d / nn.BatchNorm2d shapes)
    w = 0.1 * jax.random.normal(kw, (OUT_CHANNELS, CIN, CONV_KERNEL, CONV_KERNEL),
                                dtype=jnp.float32)
    b = 0.1 * jax.random.normal(kb, (OUT_CHANNELS,), dtype=jnp.float32)
    gamma = jnp.ones((OUT_CHANNELS,), jnp.float32)   # BatchNorm weight init
    beta = jnp.zeros((OUT_CHANNELS,), jnp.float32)   # BatchNorm bias init

    fwd = jax.jit(conv_unit_forward)
    out = jax.block_until_ready(fwd(x, w, b, gamma, beta))

    ref = conv_unit_reference(x, w, b, gamma, beta)
    assert out.shape == ref.shape == (N, OUT_CHANNELS, H // 2, W // 2)
    assert jnp.allclose(out, ref, rtol=1e-4, atol=1e-4), "mismatch vs. reference"

    print("KERNEL_OK")
</pallas_src>

<mosaic_0001>
module attributes {stable_mosaic.version = 11 : i64} {
  func.func @_conv_unit_kernel(%arg0: i32, %arg1: memref<40x512xf32, #tpu.memory_space<vmem>>, %arg2: memref<8x43xf32, #tpu.memory_space<vmem>>, %arg3: memref<8x128xf32, #tpu.memory_space<vmem>>) attributes {dimension_semantics = [#tpu.dimension_semantics<arbitrary>], iteration_bounds = array<i64: 1>, scalar_prefetch = 0 : i64, scratch_operands = 0 : i64, tpu.core_type = #tpu.core_type<tc>, window_params = [{pipeline_mode = #tpu.pipeline_mode<synchronous>, transform_indices = @transform_0, window_bounds = array<i64: 40, 512>}, {pipeline_mode = #tpu.pipeline_mode<synchronous>, transform_indices = @transform_1, window_bounds = array<i64: 8, 43>}, {pipeline_mode = #tpu.pipeline_mode<synchronous>, transform_indices = @transform_2, window_bounds = array<i64: 8, 128>}]} {
    %c0 = arith.constant 0 : index
    %c0_0 = arith.constant 0 : index
    %0 = vector.load %arg2[%c0, %c0_0] : memref<8x43xf32, #tpu.memory_space<vmem>>, vector<8x40xf32>
    %c0_1 = arith.constant 0 : index
    %c0_2 = arith.constant 0 : index
    %1 = vector.load %arg1[%c0_1, %c0_2] : memref<40x512xf32, #tpu.memory_space<vmem>>, vector<40x512xf32>
    %cst = arith.constant dense<0.000000e+00> : vector<8x512xf32>
    %2 = tpu.matmul %0, %1, %cst {dimension_numbers = #tpu.dot_dimension_numbers<[1], [0], [0], [1], [0, 0, 1, 1], [], []>, precision = #tpu.contract_precision<fp32>} : vector<8x40xf32>, vector<40x512xf32>, vector<8x512xf32> -> vector<8x512xf32>
    %3 = vector.extract_strided_slice %2 {offsets = [0, 0], sizes = [8, 128], strides = [1, 1]} : vector<8x512xf32> to vector<8x128xf32>
    %4 = vector.extract_strided_slice %2 {offsets = [0, 128], sizes = [8, 128], strides = [1, 1]} : vector<8x512xf32> to vector<8x128xf32>
    %5 = arith.maximumf %3, %4 : vector<8x128xf32>
    %6 = vector.extract_strided_slice %2 {offsets = [0, 256], sizes = [8, 128], strides = [1, 1]} : vector<8x512xf32> to vector<8x128xf32>
    %7 = arith.maximumf %5, %6 : vector<8x128xf32>
    %8 = vector.extract_strided_slice %2 {offsets = [0, 384], sizes = [8, 128], strides = [1, 1]} : vector<8x512xf32> to vector<8x128xf32>
    %9 = arith.maximumf %7, %8 : vector<8x128xf32>
    %c0_3 = arith.constant 0 : index
    %c40 = arith.constant 40 : index
    %10 = vector.load %arg2[%c0_3, %c40] : memref<8x43xf32, #tpu.memory_space<vmem>>, vector<8x1xf32>
    %11 = vector.broadcast %10 : vector<8x1xf32> to vector<8x128xf32>
    %12 = arith.addf %9, %11 : vector<8x128xf32>
    %cst_4 = arith.constant dense<0.000000e+00> : vector<8xf32>
    %13 = vector.multi_reduction <add>, %12, %cst_4 [1] : vector<8x128xf32> to vector<8xf32>
    %14 = vector.shape_cast %13 : vector<8xf32> to vector<8x1xf32>
    %cst_5 = arith.constant 7.812500e-03 : f32
    %15 = vector.broadcast %cst_5 : f32 to vector<8x1xf32>
    %16 = arith.mulf %14, %15 : vector<8x1xf32>
    %17 = vector.broadcast %16 : vector<8x1xf32> to vector<8x128xf32>
    %18 = arith.subf %12, %17 : vector<8x128xf32>
    %19 = arith.mulf %18, %18 : vector<8x128xf32>
    %cst_6 = arith.constant dense<0.000000e+00> : vector<8xf32>
    %20 = vector.multi_reduction <add>, %19, %cst_6 [1] : vector<8x128xf32> to vector<8xf32>
    %21 = vector.shape_cast %20 : vector<8xf32> to vector<8x1xf32>
    %cst_7 = arith.constant 7.812500e-03 : f32
    %22 = vector.broadcast %cst_7 : f32 to vector<8x1xf32>
    %23 = arith.mulf %21, %22 : vector<8x1xf32>
    %c0_8 = arith.constant 0 : index
    %c41 = arith.constant 41 : index
    %24 = vector.load %arg2[%c0_8, %c41] : memref<8x43xf32, #tpu.memory_space<vmem>>, vector<8x1xf32>
    %cst_9 = arith.constant 9.99999974E-6 : f32
    %25 = vector.broadcast %cst_9 : f32 to vector<8x1xf32>
    %26 = arith.addf %23, %25 : vector<8x1xf32>
    %27 = math.rsqrt %26 : vector<8x1xf32>
    %28 = arith.mulf %24, %27 : vector<8x1xf32>
    %29 = vector.broadcast %28 : vector<8x1xf32> to vector<8x128xf32>
    %30 = arith.mulf %18, %29 : vector<8x128xf32>
    %c0_10 = arith.constant 0 : index
    %c42 = arith.constant 42 : index
    %31 = vector.load %arg2[%c0_10, %c42] : memref<8x43xf32, #tpu.memory_space<vmem>>, vector<8x1xf32>
    %32 = vector.broadcast %31 : vector<8x1xf32> to vector<8x128xf32>
    %33 = arith.addf %30, %32 : vector<8x128xf32>
    %cst_11 = arith.constant 0.000000e+00 : f32
    %34 = vector.broadcast %cst_11 : f32 to vector<8x128xf32>
    %35 = arith.maximumf %33, %34 : vector<8x128xf32>
    %c0_12 = arith.constant 0 : index
    %c0_13 = arith.constant 0 : index
    %36 = vector.load %arg3[%c0_12, %c0_13] : memref<8x128xf32, #tpu.memory_space<vmem>>, vector<8x128xf32>
    tpu.vector_store %arg3[%c0_12, %c0_13], %35 {strides = array<i32>} : memref<8x128xf32, #tpu.memory_space<vmem>>, vector<8x128xf32>,
    return
  }
  func.func @transform_0(%arg0: i32) -> (i32, i32) {
    %c0_i32 = arith.constant 0 : i32
    %c0_i32_0 = arith.constant 0 : i32
    %c0_i32_1 = arith.constant 0 : i32
    return %c0_i32, %c0_i32_0 : i32, i32
  }
  func.func @transform_1(%arg0: i32) -> (i32, i32) {
    %c0_i32 = arith.constant 0 : i32
    %c0_i32_0 = arith.constant 0 : i32
    %c0_i32_1 = arith.constant 0 : i32
    return %c0_i32, %c0_i32_0 : i32, i32
  }
  func.func @transform_2(%arg0: i32) -> (i32, i32) {
    %c0_i32 = arith.constant 0 : i32
    %c0_i32_0 = arith.constant 0 : i32
    %c0_i32_1 = arith.constant 0 : i32
    return %c0_i32, %c0_i32_0 : i32, i32
  }
}

</mosaic_0001>

<bundles_post_ra>
// kernel: conv_unit_forward.1
= control target key start
LH: loop header
LB: loop body
LE: loop exit
PB: predicated region body
PF: predicated region fallthrough
CT: control target
= control target key end

     0   :  { %vm32_vm0 = vcmask 326656   ;;  %s1272_s0 = inlined_call_operand.vmem [shape: f32[40,512], index: 0, kind: input, shape index: {}]   ;;  %s1273_s1 = inlined_call_operand.vmem [shape: f32[8,43], index: 1, kind: input, shape index: {}]   ;;  %s1274_s2 = inlined_call_operand.vmem [shape: f32[8,128], index: 2, kind: output, shape index: {}]  }
   0x1   :  { %v28_v0 = vld [vmem:[%s1272_s0 + $0x80] sm:$0xff]  ;;  %v29_v8 = vld [vmem:[%s1272_s0 + $0x88] sm:$0xff] }
   0x2   :  { %v24_v1 = vld [vmem:[%s1272_s0 + $0x60] sm:$0xff]  ;;  %v909_v3 = vand.u32 4294901760, %v28_v0  ;;  %v928_v11 = vand.u32 4294901760, %v29_v8  ;;  %v25_v13 = vld [vmem:[%s1272_s0 + $0x68] sm:$0xff] }
   0x3   :  { %v20_v2 = vld [vmem:[%s1272_s0 + $0x40] sm:$0xff]  ;;  %v911_v4 = vand.u32 4294901760, %v24_v1  ;;  %v21_v22 = vld [vmem:[%s1272_s0 + $0x48] sm:$0xff]  ;;  %v966_v26 = vand.u32 4294901760, %v25_v13 }
   0x4   :  { %v913_v5 = vand.u32 4294901760, %v20_v2  ;;  %v16_v6 = vld [vmem:[%s1272_s0 + $0x20] sm:$0xff]  ;;  %48 = vmatpush.msra.mxu0 %v909_v3  ;;  %v78_v14 = vsub.f32 %v28_v0, %v909_v3  ;;  %156 = vmatpush.msra.mxu3 %v909_v3  ;;  %v956_v20 = vsub.f32 %v29_v8, %v928_v11  ;;  %v981_v34 = vand.u32 4294901760, %v21_v22  ;;  %v17_v37 = vld [vmem:[%s1272_s0 + $0x28] sm:$0xff] }
   0x5   :  { %v12_v7 = vld [vmem:[%s1272_s0] sm:$0xff]  ;;  %v924_v9 = vand.u32 4294901760, %v16_v6  ;;  %v942_v15 = vsub.f32 %v24_v1, %v911_v4  ;;  %v988_v36 = vsub.f32 %v25_v13, %v966_v26  ;;  %v13_v38 = vld [vmem:[%s1272_s0 + $0x8] sm:$0xff]  ;;  %v1015_v49 = vand.u32 4294901760, %v17_v37 }
   0x6   :  { %v926_v10 = vand.u32 4294901760, %v12_v7  ;;  %v933_v12 = vld [vmem:[%s1273_s1] sm:$0xff]  ;;  %v945_v16 = vsub.f32 %v20_v2, %v913_v5  ;;  %125 = vmatpush.msra.mxu2 %v78_v14  ;;  %50 = vmatpush.msra.mxu0 %v911_v4  ;;  %v79_v23 = vand.u32 4294901760, %v78_v14  ;;  %v277_v28 = vand.u32 4294901760, %v956_v20 }
   0x7   :  { %v34_v17 = vsel %vm32_vm0, %v933_v12, 0  ;;  %v950_v18 = vsub.f32 %v16_v6, %v924_v9  ;;  %v85_v24 = vand.u32 4294901760, %v942_v15  ;;  %158 = vmatpush.msra.mxu3 %v911_v4  ;;  %v283_v46 = vand.u32 4294901760, %v988_v36  ;;  %v30_v6 = vld [vmem:[%s1272_s0 + $0x90] sm:$0xff] }
   0x8   :  { %v953_v19 = vsub.f32 %v12_v7, %v926_v10  ;;  %v958_v21 = vand.u32 4294901760, %v34_v17  ;;  %v91_v25 = vand.u32 4294901760, %v945_v16  ;;  %128 = vmatpush.msra.mxu2 %v942_v15  ;;  %52 = vmatpush.msra.mxu0 %v913_v5  ;;  %v80_v31 = vsub.f32 %v78_v14, %v79_v23  ;;  %v18_v14 = vld [vmem:[%s1272_s0 + $0x30] sm:$0xff] }
   0x9   :  { %v97_v27 = vand.u32 4294901760, %v950_v18  ;;  %v86_v32 = vsub.f32 %v942_v15, %v85_v24  ;;  %160 = vmatpush.msra.mxu3 %v913_v5  ;;  %v278_v35 = vsub.f32 %v956_v20, %v277_v28  ;;  %v1013_v48 = vsub.f32 %v21_v22, %v981_v34 }
   0xa   :  { %v972_v29 = vsub.f32 %v34_v17, %v958_v21  ;;  %v103_v30 = vand.u32 4294901760, %v953_v19  ;;  %v92_v33 = vsub.f32 %v945_v16, %v91_v25  ;;  %v81_v39 = vand.u32 4294901760, %v80_v31  ;;  %131 = vmatpush.msra.mxu2 %v945_v16  ;;  %54 = vmatpush.msra.mxu0 %v924_v9  ;;  %v14_v17 = vld [vmem:[%s1272_s0 + $0x10] sm:$0xff] }
   0xb   :  { %v87_v40 = vand.u32 4294901760, %v86_v32  ;;  %v98_v41 = vsub.f32 %v950_v18, %v97_v27  ;;  %162 = vmatpush.msra.mxu3 %v924_v9  ;;  %v279_v44 = vand.u32 4294901760, %v278_v35  ;;  %v1017_v50 = vand.u32 4294901760, %v13_v38  ;;  %v15_v35 = vld [vmem:[%s1272_s0 + $0x18] sm:$0xff] }
   0xc   :  { %v1002_v42 = vand.u32 4294901760, %v972_v29  ;;  %v93_v43 = vand.u32 4294901760, %v92_v33  ;;  %v104_v45 = vsub.f32 %v953_v19, %v103_v30  ;;  %82 = vmatpush.msra.mxu1 %v81_v39  ;;  %134 = vmatpush.msra.mxu2 %v950_v18  ;;  %v284_v51 = vsub.f32 %v988_v36, %v283_v46 }
   0xd   :  { %56 = vmatpush.msra.mxu0 %v926_v10  ;;  %164 = vmatpush.msra.mxu3 %v926_v10  ;;  %v99_v52 = vand.u32 4294901760, %v98_v41  ;;  %v289_v53 = vand.u32 4294901760, %v1013_v48  ;;  %v1025_v54 = vsub.f32 %v17_v37, %v1015_v49  ;;  %v1028_v55 = vsub.f32 %v13_v38, %v1017_v50 }
   0xe   :  { %v60_v47 = vsub.f32 %v972_v29, %v1002_v42  ;;  %88 = vmatpush.msra.mxu1 %v87_v40  ;;  %137 = vmatpush.msra.mxu2 %v953_v19  ;;  %v285_v56 = vand.u32 4294901760, %v284_v51  ;;  %v105_v58 = vand.u32 4294901760, %v104_v45  ;;  %v1065_v7 = vand.u32 4294901760, %v30_v6 }
   0xf   :  { %186 = vmatpush.msrb.mxu0 %v79_v23  ;;  %280 = vmatpush.msrb.mxu3 %v279_v44  ;;  %v290_v59 = vsub.f32 %v1013_v48, %v289_v53  ;;  %v295_v60 = vand.u32 4294901760, %v1025_v54  ;;  %v301_v61 = vand.u32 4294901760, %v1028_v55  ;;  %v1099_v16 = vand.u32 4294901760, %v18_v14 }
  0x10   :  { %246 = vmatpush.msrb.mxu2 %v928_v11  ;;  %v1031_v57 = vand.u32 4294901760, %v60_v47  ;;  %94 = vmatpush.msra.mxu1 %v93_v43  ;;  %v1120_v22 = vand.u32 4294901760, %v14_v17  ;;  %v1179_v43 = vand.u32 4294901760, %v15_v35 }
  0x11   :  { %140 = vmatmul.f32.vlgmr.msra.gmra.mxu2 %v972_v29  ;;  %190 = vmatpush.msrb.mxu0 %v85_v24  ;;  %v291_v62 = vand.u32 4294901760, %v290_v59  ;;  %v296_v63 = vsub.f32 %v1025_v54, %v295_v60  ;;  %v302_v0 = vsub.f32 %v1028_v55, %v301_v61  ;;  %v23_v24 = vld [vmem:[%s1272_s0 + $0x58] sm:$0xff] }
  0x12   :  { %100 = vmatpush.msra.mxu1 %v99_v52  ;;  %248 = vmatpush.msrb.mxu2 %v966_v26  ;;  %v1147_v31 = vand.u32 4294901760, %v23_v24  ;;  %v1155_v33 = vsub.f32 %v14_v17, %v1120_v22  ;;  %v1201_v52 = vsub.f32 %v15_v35, %v1179_v43 }
  0x13   :  { %286 = vmatpush.msrb.mxu3 %v285_v56  ;;  %62 = vmatmul.f32.vlgmr.msra.gmra.mxu0 %v1031_v57  ;;  %v297_v1 = vand.u32 4294901760, %v296_v63  ;;  %v303_v2 = vand.u32 4294901760, %v302_v0 }
  0x14   :  { %106 = vmatpush.msra.mxu1 %v105_v58  ;;  %168 = vmatmul.f32.vlgmr.msra.gmra.mxu3 %v1002_v42  ;;  %v1177_v41 = vsub.f32 %v23_v24, %v1147_v31  ;;  %v499_v45 = vand.u32 4294901760, %v1155_v33 }
  0x15   :  { %194 = vmatpush.msrb.mxu0 %v91_v25  ;;  %250 = vmatpush.msrb.mxu2 %v981_v34  ;;  %v1130_v25 = vsub.f32 %v18_v14, %v1099_v16 }
  0x16   :  { %220 = vmatpush.msrb.mxu1 %v909_v3  ;;  %292 = vmatpush.msrb.mxu3 %v291_v62  ;;  %v26_v3 = vld [vmem:[%s1272_s0 + $0x70] sm:$0xff]  ;;  %v685_v51 = vand.u32 4294901760, %v1177_v41 }
  0x17   :  { %108 = vmatmul.f32.vlgmr.msra.gmra.mxu1 %v958_v21  ;;  %198 = vmatpush.msrb.mxu0 %v97_v27  ;;  %v1074_v8 = vand.u32 4294901760, %v26_v3 }
  0x18   :  { %222 = vmatpush.msrb.mxu1 %v911_v4  ;;  %252 = vmatpush.msrb.mxu2 %v1015_v49  ;;  %v22_v4 = vld [vmem:[%s1272_s0 + $0x50] sm:$0xff]  ;;  %v686_v59 = vsub.f32 %v1177_v41, %v685_v51 }
  0x19   :  { %298 = vmatpush.msrb.mxu3 %v297_v1  ;;  %202 = vmatpush.msrb.mxu0 %v103_v30  ;;  %v1082_v13 = vand.u32 4294901760, %v22_v4  ;;  %v1095_v15 = vsub.f32 %v26_v3, %v1074_v8  ;;  %v19_v30 = vld [vmem:[%s1272_s0 + $0x38] sm:$0xff] }
  0x1a   :  { %224 = vmatpush.msrb.mxu1 %v913_v5  ;;  %254 = vmatpush.msrb.mxu2 %v1017_v50  ;;  %v1080_v5 = vsub.f32 %v30_v6, %v1065_v7  ;;  %v1167_v38 = vand.u32 4294901760, %v19_v30  ;;  %v687_v0 = vand.u32 4294901760, %v686_v59  ;;  %v883_v59 = vmov 41  }
  0x1b   :  { %304 = vmatpush.msrb.mxu3 %v303_v2  ;;  %323 = vmatpush.msra.mxu0 %v956_v20  ;;  %v481_v20 = vand.u32 4294901760, %v1095_v15 }
  0x1c   :  { %384 = vmatpush.msra.mxu2 %v277_v28  ;;  %226 = vmatpush.msrb.mxu1 %v924_v9  ;;  %v31_v9 = vld [vmem:[%s1272_s0 + $0x98] sm:$0xff]  ;;  %v475_v19 = vand.u32 4294901760, %v1080_v5 }
  0x1d   :  { %260 = vmatmul.f32.vlgmr.msrb.gmra.mxu2 %v1031_v57  ;;  %418 = vmatpush.msra.mxu3 %v928_v11  ;;  %v1104_v18 = vand.u32 4294901760, %v31_v9  ;;  %v482_v32 = vsub.f32 %v1095_v15, %v481_v20 }
  0x1e   :  { %326 = vmatpush.msra.mxu0 %v988_v36  ;;  %388 = vmatpush.msra.mxu2 %v283_v46  ;;  %v476_v27 = vsub.f32 %v1080_v5, %v475_v19  ;;  %v493_v36 = vand.u32 4294901760, %v1130_v25 }
  0x1f   :  { %204 = vmatmul.f32.vlgmr.msrb.gmra.mxu0 %v958_v21  ;;  %228 = vmatpush.msrb.mxu1 %v926_v10  ;;  %v27_v10 = vld [vmem:[%s1272_s0 + $0x78] sm:$0xff]  ;;  %v483_v44 = vand.u32 4294901760, %v482_v32 }
  0x20   :  { %306 = vmatmul.f32.vlgmr.msrb.gmra.mxu3 %v958_v21  ;;  %329 = vmatpush.msra.mxu0 %v1013_v48  ;;  %v1122_v23 = vand.u32 4294901760, %v27_v10  ;;  %v477_v39 = vand.u32 4294901760, %v476_v27  ;;  %v494_v47 = vsub.f32 %v1130_v25, %v493_v36 }
  0x21   :  { %420 = vmatpush.msra.mxu3 %v966_v26  ;;  %354 = vmatpush.msra.mxu1 %v928_v11  ;;  %v1114_v11 = vsub.f32 %v22_v4, %v1082_v13 }
  0x22   :  { %392 = vmatpush.msra.mxu2 %v289_v53  ;;  %230 = vmatmul.f32.vlgmr.msrb.gmra.mxu1 %v958_v21  ;;  %v500_v53 = vsub.f32 %v1155_v33, %v499_v45 }
  0x23   :  { %422 = vmatpush.msra.mxu3 %v981_v34  ;;  %332 = vmatpush.msra.mxu0 %v1025_v54  ;;  %v487_v28 = vand.u32 4294901760, %v1114_v11 }
  0x24   :  { %356 = vmatpush.msra.mxu1 %v966_v26  ;;  %396 = vmatpush.msra.mxu2 %v295_v60  ;;  %v1133_v26 = vsub.f32 %v31_v9, %v1104_v18  ;;  %v697_v60 = vand.u32 4294901760, %v1201_v52 }
  0x25   :  { %424 = vmatpush.msra.mxu3 %v1015_v49  ;;  %335 = vmatpush.msra.mxu0 %v1028_v55  ;;  %v488_v40 = vsub.f32 %v1114_v11, %v487_v28  ;;  %v495_v55 = vand.u32 4294901760, %v494_v47 }
  0x26   :  { %358 = vmatpush.msra.mxu1 %v981_v34  ;;  %400 = vmatpush.msra.mxu2 %v301_v61  ;;  %v1158_v34 = vsub.f32 %v27_v10, %v1122_v23  ;;  %v673_v37 = vand.u32 4294901760, %v1133_v26  ;;  %v501_v61 = vand.u32 4294901760, %v500_v53  ;;  %v698_v1 = vsub.f32 %v1201_v52, %v697_v60 }
  0x27   :  { %402 = vmatmul.f32.vlgmr.msra.gmra.mxu2 %v958_v21  ;;  %426 = vmatpush.msra.mxu3 %v1017_v50 }
  0x28   :  { %444 = vmatpush.msrb.mxu0 %v1065_v7  ;;  %521 = vmatpush.msrb.mxu2 %v1080_v5  ;;  %v679_v46 = vand.u32 4294901760, %v1158_v34  ;;  %v674_v48 = vsub.f32 %v1133_v26, %v673_v37  ;;  %v699_v6 = vand.u32 4294901760, %v698_v1 }
  0x29   :  { %360 = vmatpush.msra.mxu1 %v1015_v49  ;;  %552 = vmatpush.msrb.mxu3 %v1065_v7  ;;  %v1194_v49 = vsub.f32 %v19_v30, %v1167_v38 }
  0x2a   :  { %338 = vmatmul.f32.vlgmr.msra.gmra.mxu0 %v972_v29  ;;  %428 = vmatmul.f32.vlgmr.msra.gmra.mxu3 %v958_v21  ;;  %v680_v54 = vsub.f32 %v1158_v34, %v679_v46  ;;  %v675_v56 = vand.u32 4294901760, %v674_v48 }
  0x2b   :  { %446 = vmatpush.msrb.mxu0 %v1074_v8  ;;  %524 = vmatpush.msrb.mxu2 %v1095_v15  ;;  %v691_v58 = vand.u32 4294901760, %v1194_v49 }
  0x2c   :  { %362 = vmatpush.msra.mxu1 %v1017_v50  ;;  %554 = vmatpush.msrb.mxu3 %v1074_v8  ;;  %v489_v50 = vand.u32 4294901760, %v488_v40  ;;  %v681_v62 = vand.u32 4294901760, %v680_v54 }
  0x2d   :  { %366 = vmatmul.f32.vlgmr.msra.gmra.mxu1 %v1002_v42  ;;  %448 = vmatpush.msrb.mxu0 %v1082_v13  ;;  %v692_v63 = vsub.f32 %v1194_v49, %v691_v58 }
  0x2e   :  { %478 = vmatpush.msrb.mxu1 %v477_v39  ;;  %527 = vmatpush.msrb.mxu2 %v1114_v11 }
  0x2f   :  { %556 = vmatpush.msrb.mxu3 %v1082_v13  ;;  %450 = vmatpush.msrb.mxu0 %v1099_v16  ;;  %v693_v2 = vand.u32 4294901760, %v692_v63 }
  0x30   :  { %484 = vmatpush.msrb.mxu1 %v483_v44  ;;  %530 = vmatpush.msrb.mxu2 %v1130_v25 }
  0x31   :  { %558 = vmatpush.msrb.mxu3 %v1099_v16  ;;  %452 = vmatpush.msrb.mxu0 %v1120_v22 }
  0x32   :  { %490 = vmatpush.msrb.mxu1 %v489_v50  ;;  %533 = vmatpush.msrb.mxu2 %v1155_v33 }
  0x33   :  { %536 = vmatmul.f32.vlgmr.msrb.gmra.mxu2 %v972_v29  ;;  %560 = vmatpush.msrb.mxu3 %v1120_v22 }
  0x34   :  { %582 = vmatpush.msra.mxu0 %v475_v19  ;;  %642 = vmatpush.msra.mxu2 %v1104_v18 }
  0x35   :  { %496 = vmatpush.msrb.mxu1 %v495_v55  ;;  %676 = vmatpush.msra.mxu3 %v675_v56 }
  0x36   :  { %458 = vmatmul.f32.vlgmr.msrb.gmra.mxu0 %v1031_v57  ;;  %564 = vmatmul.f32.vlgmr.msrb.gmra.mxu3 %v1002_v42 }
  0x37   :  { %586 = vmatpush.msra.mxu0 %v481_v20  ;;  %644 = vmatpush.msra.mxu2 %v1122_v23 }
  0x38   :  { %502 = vmatpush.msrb.mxu1 %v501_v61  ;;  %682 = vmatpush.msra.mxu3 %v681_v62 }
  0x39   :  { %504 = vmatmul.f32.vlgmr.msrb.gmra.mxu1 %v958_v21  ;;  %590 = vmatpush.msra.mxu0 %v487_v28 }
  0x3a   :  { %616 = vmatpush.msra.mxu1 %v1065_v7  ;;  %646 = vmatpush.msra.mxu2 %v1147_v31 }
  0x3b   :  { %688 = vmatpush.msra.mxu3 %v687_v0  ;;  %594 = vmatpush.msra.mxu0 %v493_v36 }
  0x3c   :  { %618 = vmatpush.msra.mxu1 %v1074_v8  ;;  %648 = vmatpush.msra.mxu2 %v1167_v38 }
  0x3d   :  { %694 = vmatpush.msra.mxu3 %v693_v2  ;;  %598 = vmatpush.msra.mxu0 %v499_v45 }
  0x3e   :  { %620 = vmatpush.msra.mxu1 %v1082_v13  ;;  %650 = vmatpush.msra.mxu2 %v1179_v43 }
  0x3f   :  { %700 = vmatpush.msra.mxu3 %v699_v6  ;;  %719 = vmatpush.msrb.mxu0 %v1133_v26 }
  0x40   :  { %780 = vmatpush.msrb.mxu2 %v673_v37  ;;  %600 = vmatmul.f32.vlgmr.msra.gmra.mxu0 %v958_v21 }
  0x41   :  { %622 = vmatpush.msra.mxu1 %v1099_v16  ;;  %656 = vmatmul.f32.vlgmr.msra.gmra.mxu2 %v1031_v57  ;;  %v882_v57 = vmov 40  }
  0x42   :  { %702 = vmatmul.f32.vlgmr.msra.gmra.mxu3 %v958_v21  ;;  %722 = vmatpush.msrb.mxu0 %v1158_v34 }
  0x43   :  { %784 = vmatpush.msrb.mxu2 %v679_v46  ;;  %814 = vmatpush.msrb.mxu3 %v1104_v18 }
  0x44   :  { %624 = vmatpush.msra.mxu1 %v1120_v22  ;;  %725 = vmatpush.msrb.mxu0 %v1177_v41 }
  0x45   :  { %626 = vmatmul.f32.vlgmr.msra.gmra.mxu1 %v958_v21  ;;  %788 = vmatpush.msrb.mxu2 %v685_v51 }
  0x46   :  { %750 = vmatpush.msrb.mxu1 %v1104_v18  ;;  %816 = vmatpush.msrb.mxu3 %v1122_v23 }
  0x47   :  { %728 = vmatpush.msrb.mxu0 %v1194_v49  ;;  %792 = vmatpush.msrb.mxu2 %v691_v58 }
  0x48   :  { %752 = vmatpush.msrb.mxu1 %v1122_v23  ;;  %818 = vmatpush.msrb.mxu3 %v1147_v31 }
  0x49   :  { %731 = vmatpush.msrb.mxu0 %v1201_v52  ;;  %796 = vmatpush.msrb.mxu2 %v697_v60  ;;  %v884_v60 = vmov 42  }
  0x4a   :  { %754 = vmatpush.msrb.mxu1 %v1147_v31  ;;  %820 = vmatpush.msrb.mxu3 %v1167_v38 }
  0x4b   :  { %734 = vmatmul.f32.vlgmr.msrb.gmra.mxu0 %v972_v29  ;;  %798 = vmatmul.f32.vlgmr.msrb.gmra.mxu2 %v958_v21 }
  0x4c   :  { %756 = vmatpush.msrb.mxu1 %v1167_v38  ;;  %822 = vmatpush.msrb.mxu3 %v1179_v43 }
  0x4d   :  { %824 = vmatmul.f32.vlgmr.msrb.gmra.mxu3 %v958_v21  ;;  %876 = vset.pattern.permute.xlu0 %v882_v57 }
  0x4e   :  { %758 = vmatpush.msrb.mxu1 %v1179_v43  ;;  %832 = vperm.xlu0 %876, %v933_v12  }
  0x4f   :  { %762 = vmatmul.f32.vlgmr.msrb.gmra.mxu1 %v1002_v42  ;;  %877 = vset.pattern.permute.xlu1 %v883_v59 }
  0x50   :  { %878 = vset.pattern.permute.xlu2 %v884_v60 }
  0x51   :  { %863 = vperm.xlu2 %878, %v933_v12  }
  0x56   :  { %879 = vset.pattern.permute.xlu0 %v884_v60 }
  0x90   :  { %v63_v3 = vpop.f32.mrf.mxu0 }
  0x94   :  { %v109_v7 = vpop.f32.mrf.mxu1  ;;  %v141_v29 = vpop.f32.mrf.mxu2 }
  0x95   :  { %v110_v20 = vadd.f32 %v109_v7, %v63_v3 }
  0x97   :  { %v169_v4 = vpop.f32.mrf.mxu3  ;;  %v142_v24 = vadd.f32 %v141_v29, %v110_v20 }
  0x99   :  { %v170_v30 = vadd.f32 %v169_v4, %v142_v24 }
  0x9c   :  { %v205_v8 = vpop.f32.mrf.mxu0 }
  0x9d   :  { %v206_v36 = vadd.f32 %v205_v8, %v170_v30 }
  0x9f   :  { %v231_v5 = vpop.f32.mrf.mxu1 }
  0xa0   :  { %v261_v14 = vpop.f32.mrf.mxu2  ;;  %v232_v41 = vadd.f32 %v231_v5, %v206_v36 }
  0xa3   :  { %v307_v13 = vpop.f32.mrf.mxu3 }
  0xa4   :  { %v308_v10 = vadd.f32 %v307_v13, %v261_v14 }
  0xa7   :  { %v339_v9 = vpop.f32.mrf.mxu0 }
  0xa8   :  { %v340_v23 = vadd.f32 %v339_v9, %v308_v10 }
  0xaa   :  { %v367_v15 = vpop.f32.mrf.mxu1  ;;  %v403_v21 = vpop.f32.mrf.mxu2 }
  0xab   :  { %v368_v27 = vadd.f32 %v367_v15, %v340_v23  ;;  %v864_v8 = vpop.permute.xlu2 %863 }
  0xad   :  { %v429_v16 = vpop.f32.mrf.mxu3  ;;  %v404_v33 = vadd.f32 %v403_v21, %v368_v27 }
  0xaf   :  { %v430_v38 = vadd.f32 %v429_v16, %v404_v33 }
  0xb1   :  { %v828_v46 = vmax.f32 %v232_v41, %v430_v38 }
  0xb3   :  { %v459_v17 = vpop.f32.mrf.mxu0 }
  0xb6   :  { %v505_v18 = vpop.f32.mrf.mxu1  ;;  %v537_v11 = vpop.f32.mrf.mxu2 }
  0xb7   :  { %v506_v22 = vadd.f32 %v505_v18, %v459_v17 }
  0xb9   :  { %v565_v19 = vpop.f32.mrf.mxu3  ;;  %v538_v25 = vadd.f32 %v537_v11, %v506_v22 }
  0xbb   :  { %v566_v31 = vadd.f32 %v565_v19, %v538_v25 }
  0xbd   :  { %v601_v42 = vpop.f32.mrf.mxu0 }
  0xbe   :  { %v602_v37 = vadd.f32 %v601_v42, %v566_v31 }
  0xc0   :  { %v833_v51 = vpop.permute.xlu0 %832 }
  0xc2   :  { %v627_v26 = vpop.f32.mrf.mxu1 }
  0xc3   :  { %v628_v43 = vadd.f32 %v627_v26, %v602_v37 }
  0xc4   :  { %v657_v28 = vpop.f32.mrf.mxu2 }
  0xc5   :  { %v703_v32 = vpop.f32.mrf.mxu3  ;;  %v829_v49 = vmax.f32 %v828_v46, %v628_v43 }
  0xc6   :  { %v704_v34 = vadd.f32 %v703_v32, %v657_v28 }
  0xc8   :  { %v735_v35 = vpop.f32.mrf.mxu0 }
  0xc9   :  { %v736_v39 = vadd.f32 %v735_v35, %v704_v34 }
  0xcc   :  { %v763_v40 = vpop.f32.mrf.mxu1 }
  0xcd   :  { %v764_v44 = vadd.f32 %v763_v40, %v736_v39 }
  0xce   :  { %v799_v45 = vpop.f32.mrf.mxu2 }
  0xcf   :  { %v800_v47 = vadd.f32 %v799_v45, %v764_v44 }
  0xd0   :  { %v825_v48 = vpop.f32.mrf.mxu3 }
  0xd1   :  { %v826_v50 = vadd.f32 %v825_v48, %v800_v47 }
  0xd3   :  { %v830_v52 = vmax.f32 %v829_v49, %v826_v50 }
  0xd5   :  { %v835_v53 = vadd.f32 %v833_v51, %v830_v52 }
  0xd7   :  { %836 = vadd.xlane.f32.xlu0 %v835_v53 }
 0x14a   :  { %v837_v54 = vpop.xlane.xlu0 %836 }
 0x14b   :  { %v838_v55 = vmul.f32 0.0078125, %v837_v54 }
 0x14d   :  { %v839_v56 = vsub.f32 %v835_v53, %v838_v55 }
 0x14f   :  { %v840_v58 = vmul.f32 %v839_v56, %v839_v56 }
 0x151   :  { %841 = vadd.xlane.f32.xlu1 %v840_v58 }
 0x1c4   :  { %v842_v61 = vpop.xlane.xlu1 %841 }
 0x1c5   :  { %v843_v62 = vmul.f32 0.0078125, %v842_v61 }
 0x1c7   :  { %v844_v63 = vadd.f32 1e-05, %v843_v62 }
 0x1c9   :  { %880 = vrsqrt.f32 %v844_v63  ;;  %vm851_vm2 = vweird.f32 %v844_v63 }
 0x1cf   :  { %v881_v0 = vpop.eup %880 }
 0x1d0   :  { %v846_v1 = vmul.f32 %v881_v0, %v844_v63  ;;  %vm852_vm1 = vweird.f32 %v881_v0 }
 0x1d1   :  { %vm853_vm3 = vmor %vm851_vm2, %vm852_vm1 }
 0x1d2   :  { %v847_v2 = vmul.f32 %v881_v0, %v846_v1 }
 0x1d4   :  { %v848_v6 = vmul.f32 0.5, %v847_v2 }
 0x1d6   :  { %v849_v57 = vsub.f32 1.5, %v848_v6 }
 0x1d8   :  { %v850_v3 = vmul.f32 %v881_v0, %v849_v57 }
 0x1da   :  { %v854_v7 = vsel %vm853_vm3, %v881_v0, %v850_v3 }
 0x1db   :  { %v855_v4 = vmul.f32 %v854_v7, %v933_v12 }
 0x1dd   :  { %858 = vperm.xlu1 %877, %v855_v4  }
 0x24f   :  { %v859_v29 = vpop.permute.xlu1 %858 }
 0x250   :  { %v861_v5 = vmul.f32 %v859_v29, %v839_v56 }
 0x252   :  { %v866_v13 = vadd.f32 %v864_v8, %v861_v5 }
 0x254   :  { %v867_v14 = vmax.f32 %v866_v13, 0.0 }
 0x256   :  { %868 = vst [vmem:[%s1274_s2] sm:$0xff] %v867_v14 }

</bundles_post_ra>
